<compile_context>
chip_gen: v6e
topology: v6e:2x2x1
jax: 0.10.0
libtpu: 0.0.40
codegen_flags: <defaults>
</compile_context>

<pallas_src>
import functools

import jax
import jax.numpy as jnp
from jax.experimental import pallas as pl
from jax.experimental.pallas import tpu as pltpu


def _round_up(n, m):
    return ((n + m - 1) // m) * m


def mlp_kernel(x_ref, w1_ref, b1_ref, w2_ref, b2_ref, w3_ref, b3_ref, o_ref):
    # Weights are pre-transposed to (in, out): plain dots, no in-kernel .T.
    # fc1 + relu
    h1 = jnp.dot(x_ref[...], w1_ref[...], preferred_element_type=jnp.float32)
    h1 = jnp.maximum(h1 + b1_ref[...], 0.0)
    # fc2 + relu
    h2 = jnp.dot(h1, w2_ref[...], preferred_element_type=jnp.float32)
    h2 = jnp.maximum(h2 + b2_ref[...], 0.0)
    # out (no activation); narrow (out_features-wide) store.
    o = jnp.dot(h2, w3_ref[...], preferred_element_type=jnp.float32)
    o_ref[...] = (o + b3_ref[...]).astype(o_ref.dtype)


def prepare_params(params):
    """One-time prep: transpose to (in, out), zero-pad hidden dim to 128.

    params = (w1, b1, w2, b2, w3, b3) in torch nn.Linear layout:
      w*: (out_features, in_features), b*: (out_features,).
    Padding is exact: padded weight rows/cols and biases are zero, ReLU(0)=0,
    and the padded hidden columns contribute nothing downstream.
    """
    w1, b1, w2, b2, w3, b3 = params
    in_feat = w1.shape[1]
    hidden = w1.shape[0]
    out_feat = w3.shape[0]
    Hp = _round_up(hidden, 128)

    def prep_w(w, rows, cols):
        wt = jnp.asarray(w, jnp.float32).T  # (in_features, out_features)
        return jnp.pad(wt, ((0, rows - wt.shape[0]), (0, cols - wt.shape[1])))

    def prep_b(b, cols):
        b2d = jnp.asarray(b, jnp.float32).reshape(1, -1)
        return jnp.pad(b2d, ((0, 0), (0, cols - b2d.shape[1])))

    return (
        prep_w(w1, in_feat, Hp), prep_b(b1, Hp),
        prep_w(w2, Hp, Hp), prep_b(b2, Hp),
        prep_w(w3, Hp, out_feat), prep_b(b3, out_feat),
    )


@functools.partial(jax.jit, static_argnames=("tb_max",))
def mlp_forward(x, prepped, *, tb_max=4096):
    """x: (B, 1, imsize, imsize) or anything reshapeable to (-1, in_feat).

    prepped: output of prepare_params() (computed once, reused every call).
    Returns (B, output_size) float32.
    """
    w1p, b1p, w2p, b2p, w3p, b3p = prepped
    in_feat = w1p.shape[0]
    Hp = w1p.shape[1]
    out_feat = w3p.shape[1]

    # torch .view(-1, imsize*imsize) on contiguous NCHW == reshape.
    x2d = x.reshape(-1, in_feat).astype(jnp.float32)
    B = x2d.shape[0]

    # Batch tile: sublane multiple of 8, capped, and >=2 grid steps when the
    # batch is large enough so the "parallel" axis can use both v7x TCs.
    TB = min(tb_max, max(8, _round_up(-(-B // 2), 8)))
    grid = (pl.cdiv(B, TB),)

    const = lambda i: (0, 0)  # weights/biases VMEM-resident across grid steps
    out = pl.pallas_call(
        mlp_kernel,
        out_shape=jax.ShapeDtypeStruct((B, out_feat), jnp.float32),
        grid=grid,
        in_specs=[
            pl.BlockSpec((TB, in_feat), lambda i: (i, 0)),  # activations: tiled
            pl.BlockSpec((in_feat, Hp), const),
            pl.BlockSpec((1, Hp), const),
            pl.BlockSpec((Hp, Hp), const),
            pl.BlockSpec((1, Hp), const),
            pl.BlockSpec((Hp, out_feat), const),
            pl.BlockSpec((1, out_feat), const),
        ],
        out_specs=pl.BlockSpec((TB, out_feat), lambda i: (i, 0)),
        compiler_params=pltpu.CompilerParams(
            dimension_semantics=("parallel",),
            vmem_limit_bytes=48 * 1024 * 1024,
        ),
    )(x2d, w1p, b1p, w2p, b2p, w3p, b3p)
    return out


def init_params(key, input_size, hidden_size, output_size):
    """Matches nn.init.normal_(weight, 0, 0.01) and constant_(bias, 0)."""
    in_features = input_size * input_size
    k1, k2, k3 = jax.random.split(key, 3)
    w1 = 0.01 * jax.random.normal(k1, (hidden_size, in_features), jnp.float32)
    b1 = jnp.zeros((hidden_size,), jnp.float32)
    w2 = 0.01 * jax.random.normal(k2, (hidden_size, hidden_size), jnp.float32)
    b2 = jnp.zeros((hidden_size,), jnp.float32)
    w3 = 0.01 * jax.random.normal(k3, (output_size, hidden_size), jnp.float32)
    b3 = jnp.zeros((output_size,), jnp.float32)
    return (w1, b1, w2, b2, w3, b3)


def _reference(x_nchw, params):
    w1, b1, w2, b2, w3, b3 = params
    xr = x_nchw.reshape(-1, w1.shape[1]).astype(jnp.float32)
    h = jnp.maximum(xr @ w1.T + b1, 0.0)
    h = jnp.maximum(h @ w2.T + b2, 0.0)
    return h @ w3.T + b3


if __name__ == "__main__":
    key = jax.random.PRNGKey(0)
    k_x, k_x2, k_p = jax.random.split(key, 3)

    input_size = 16    # imsize -> flattened features = 256
    hidden_size = 32
    output_size = 10
    batch = 2

    params = init_params(k_p, input_size, hidden_size, output_size)
    prepped = prepare_params(params)           # one-time weight prep
    prepped = jax.block_until_ready(prepped)

    # Small case (B=2): exercises a partial (clipped) batch block.
    x = jax.random.normal(k_x, (batch, 1, input_size, input_size), jnp.float32)
    out = mlp_forward(x, prepped)
    jax.block_until_ready(out)
    ref = _reference(x, params)
    assert out.shape == (batch, output_size)
    assert jnp.allclose(out, ref, atol=1e-5, rtol=1e-5)

    # Non-aligned batch (B=37): exercises multi-step grid + clipped last tile.
    x2 = jax.random.normal(k_x2, (37, 1, input_size, input_size), jnp.float32)
    out2 = mlp_forward(x2, prepped)
    jax.block_until_ready(out2)
    ref2 = _reference(x2, params)
    assert out2.shape == (37, output_size)
    assert jnp.allclose(out2, ref2, atol=1e-5, rtol=1e-5)

    print("KERNEL_OK")
</pallas_src>

<mosaic_0001>
module attributes {stable_mosaic.version = 11 : i64} {
  func.func @mlp_kernel(%arg0: i32, %arg1: memref<8x256xf32, #tpu.memory_space<vmem>>, %arg2: memref<256x128xf32, #tpu.memory_space<vmem>>, %arg3: memref<1x128xf32, #tpu.memory_space<vmem>>, %arg4: memref<128x128xf32, #tpu.memory_space<vmem>>, %arg5: memref<1x128xf32, #tpu.memory_space<vmem>>, %arg6: memref<128x10xf32, #tpu.memory_space<vmem>>, %arg7: memref<1x10xf32, #tpu.memory_space<vmem>>, %arg8: memref<8x10xf32, #tpu.memory_space<vmem>>) attributes {dimension_semantics = [#tpu.dimension_semantics<parallel>], iteration_bounds = array<i64: 1>, scalar_prefetch = 0 : i64, scratch_operands = 0 : i64, tpu.core_type = #tpu.core_type<tc>, window_params = [{transform_indices = @transform_0, window_bounds = array<i64: 8, 256>}, {pipeline_mode = #tpu.pipeline_mode<synchronous>, transform_indices = @transform_1, window_bounds = array<i64: 256, 128>}, {pipeline_mode = #tpu.pipeline_mode<synchronous>, transform_indices = @transform_2, window_bounds = array<i64: 1, 128>}, {pipeline_mode = #tpu.pipeline_mode<synchronous>, transform_indices = @transform_3, window_bounds = array<i64: 128, 128>}, {pipeline_mode = #tpu.pipeline_mode<synchronous>, transform_indices = @transform_4, window_bounds = array<i64: 1, 128>}, {pipeline_mode = #tpu.pipeline_mode<synchronous>, transform_indices = @transform_5, window_bounds = array<i64: 128, 10>}, {pipeline_mode = #tpu.pipeline_mode<synchronous>, transform_indices = @transform_6, window_bounds = array<i64: 1, 10>}, {transform_indices = @transform_7, window_bounds = array<i64: 8, 10>}]} {
    %c0 = arith.constant 0 : index
    %c0_0 = arith.constant 0 : index
    %0 = vector.load %arg1[%c0, %c0_0] : memref<8x256xf32, #tpu.memory_space<vmem>>, vector<8x256xf32>
    %c0_1 = arith.constant 0 : index
    %c0_2 = arith.constant 0 : index
    %1 = vector.load %arg2[%c0_1, %c0_2] : memref<256x128xf32, #tpu.memory_space<vmem>>, vector<256x128xf32>
    %cst = arith.constant dense<0.000000e+00> : vector<8x128xf32>
    %2 = tpu.matmul %0, %1, %cst {dimension_numbers = #tpu.dot_dimension_numbers<[1], [0], [0], [1], [0, 0, 1, 1], [], []>} : vector<8x256xf32>, vector<256x128xf32>, vector<8x128xf32> -> vector<8x128xf32>
    %c0_3 = arith.constant 0 : index
    %c0_4 = arith.constant 0 : index
    %3 = vector.load %arg3[%c0_3, %c0_4] : memref<1x128xf32, #tpu.memory_space<vmem>>, vector<1x128xf32>
    %4 = vector.broadcast %3 : vector<1x128xf32> to vector<8x128xf32>
    %5 = arith.addf %2, %4 : vector<8x128xf32>
    %cst_5 = arith.constant 0.000000e+00 : f32
    %6 = vector.broadcast %cst_5 : f32 to vector<8x128xf32>
    %7 = arith.maximumf %5, %6 : vector<8x128xf32>
    %c0_6 = arith.constant 0 : index
    %c0_7 = arith.constant 0 : index
    %8 = vector.load %arg4[%c0_6, %c0_7] : memref<128x128xf32, #tpu.memory_space<vmem>>, vector<128x128xf32>
    %cst_8 = arith.constant dense<0.000000e+00> : vector<8x128xf32>
    %9 = tpu.matmul %7, %8, %cst_8 {dimension_numbers = #tpu.dot_dimension_numbers<[1], [0], [0], [1], [0, 0, 1, 1], [], []>} : vector<8x128xf32>, vector<128x128xf32>, vector<8x128xf32> -> vector<8x128xf32>
    %c0_9 = arith.constant 0 : index
    %c0_10 = arith.constant 0 : index
    %10 = vector.load %arg5[%c0_9, %c0_10] : memref<1x128xf32, #tpu.memory_space<vmem>>, vector<1x128xf32>
    %11 = vector.broadcast %10 : vector<1x128xf32> to vector<8x128xf32>
    %12 = arith.addf %9, %11 : vector<8x128xf32>
    %cst_11 = arith.constant 0.000000e+00 : f32
    %13 = vector.broadcast %cst_11 : f32 to vector<8x128xf32>
    %14 = arith.maximumf %12, %13 : vector<8x128xf32>
    %c0_12 = arith.constant 0 : index
    %c0_13 = arith.constant 0 : index
    %15 = vector.load %arg6[%c0_12, %c0_13] : memref<128x10xf32, #tpu.memory_space<vmem>>, vector<128x10xf32>
    %cst_14 = arith.constant dense<0.000000e+00> : vector<8x10xf32>
    %16 = tpu.matmul %14, %15, %cst_14 {dimension_numbers = #tpu.dot_dimension_numbers<[1], [0], [0], [1], [0, 0, 1, 1], [], []>} : vector<8x128xf32>, vector<128x10xf32>, vector<8x10xf32> -> vector<8x10xf32>
    %c0_15 = arith.constant 0 : index
    %c0_16 = arith.constant 0 : index
    %17 = vector.load %arg7[%c0_15, %c0_16] : memref<1x10xf32, #tpu.memory_space<vmem>>, vector<1x10xf32>
    %18 = vector.broadcast %17 : vector<1x10xf32> to vector<8x10xf32>
    %19 = arith.addf %16, %18 : vector<8x10xf32>
    %c0_17 = arith.constant 0 : index
    %c0_18 = arith.constant 0 : index
    %20 = vector.load %arg8[%c0_17, %c0_18] : memref<8x10xf32, #tpu.memory_space<vmem>>, vector<8x10xf32>
    tpu.vector_store %arg8[%c0_17, %c0_18], %19 {strides = array<i32>} : memref<8x10xf32, #tpu.memory_space<vmem>>, vector<8x10xf32>,
    return
  }
  func.func @transform_0(%arg0: i32) -> (i32, i32) {
    %c0_i32 = arith.constant 0 : i32
    %c0_i32_0 = arith.constant 0 : i32
    return %arg0, %c0_i32 : i32, i32
  }
  func.func @transform_1(%arg0: i32) -> (i32, i32) {
    %c0_i32 = arith.constant 0 : i32
    %c0_i32_0 = arith.constant 0 : i32
    %c0_i32_1 = arith.constant 0 : i32
    return %c0_i32, %c0_i32_0 : i32, i32
  }
  func.func @transform_2(%arg0: i32) -> (i32, i32) {
    %c0_i32 = arith.constant 0 : i32
    %c0_i32_0 = arith.constant 0 : i32
    %c0_i32_1 = arith.constant 0 : i32
    return %c0_i32, %c0_i32_0 : i32, i32
  }
  func.func @transform_3(%arg0: i32) -> (i32, i32) {
    %c0_i32 = arith.constant 0 : i32
    %c0_i32_0 = arith.constant 0 : i32
    %c0_i32_1 = arith.constant 0 : i32
    return %c0_i32, %c0_i32_0 : i32, i32
  }
  func.func @transform_4(%arg0: i32) -> (i32, i32) {
    %c0_i32 = arith.constant 0 : i32
    %c0_i32_0 = arith.constant 0 : i32
    %c0_i32_1 = arith.constant 0 : i32
    return %c0_i32, %c0_i32_0 : i32, i32
  }
  func.func @transform_5(%arg0: i32) -> (i32, i32) {
    %c0_i32 = arith.constant 0 : i32
    %c0_i32_0 = arith.constant 0 : i32
    %c0_i32_1 = arith.constant 0 : i32
    return %c0_i32, %c0_i32_0 : i32, i32
  }
  func.func @transform_6(%arg0: i32) -> (i32, i32) {
    %c0_i32 = arith.constant 0 : i32
    %c0_i32_0 = arith.constant 0 : i32
    %c0_i32_1 = arith.constant 0 : i32
    return %c0_i32, %c0_i32_0 : i32, i32
  }
  func.func @transform_7(%arg0: i32) -> (i32, i32) {
    %c0_i32 = arith.constant 0 : i32
    %c0_i32_0 = arith.constant 0 : i32
    return %arg0, %c0_i32 : i32, i32
  }
}

</mosaic_0001>

<bundles_post_ra>
// kernel: mlp_forward.1
= control target key start
LH: loop header
LB: loop body
LE: loop exit
PB: predicated region body
PF: predicated region fallthrough
CT: control target
= control target key end

     0   :  { %12 = vsyncpa [#allocation3], 0  ;;  %s791_s0 = inlined_call_operand.vmem [shape: f32[2,256], index: 0, kind: input, shape index: {}]   ;;  %s792_s1 = inlined_call_operand.hbm [shape: f32[256,128], index: 1, kind: input, shape index: {}]   ;;  %s793_s2 = inlined_call_operand.vmem [shape: f32[1,128], index: 2, kind: input, shape index: {}]   ;;  %s794_s3 = inlined_call_operand.vmem [shape: f32[128,128], index: 3, kind: input, shape index: {}]   ;;  %s795_s4 = inlined_call_operand.vmem [shape: f32[1,128], index: 4, kind: input, shape index: {}]   ;;  %s796_s5 = inlined_call_operand.vmem [shape: f32[128,10], index: 5, kind: input, shape index: {}]   ;;  %s797_s6 = inlined_call_operand.vmem [shape: f32[1,10], index: 6, kind: input, shape index: {}]   ;;  %s798_s7 = inlined_call_operand.hbm [shape: f32[2,10], index: 7, kind: output, shape index: {}]  }
   0x1   :  { %13 = vsyncpa [#allocation4], 0  ;;  %s584_s24 = smov [#allocation2]  }
   0x2   :  { %s21_s25 = sshll.u32 %s584_s24, 4  ;;  %s22_s25 = int_to_ptr.vmem [resolvable:$true] %s21_s25 }
   0x3   :  { %s548_s26 = scalar_lea.vmem %s22_s25, 4096  ;;  %p553_p1 = scmp.lt.s32.totalorder %s22_s25, %s22_s25 }
   0x4   :  { %p549_p0 = scmp.ne.s32.totalorder %s22_s25, %s548_s26  ;;  %p554_p2 = scmp.lt.s32.totalorder %s548_s26, %s548_s26 }
   0x6   :  { %p555_p3 = por %p554_p2, %p553_p1 }
   0x8   :  { %p556_p4 = pnand %p555_p3, %p549_p0 }
   0xa   :  { %559 = shalt.err (!%p556_p4)
}
   0xb   :  { %s585_s27 = smov 128   ;;  %s586_s28 = smov 8  }
   0xc   :  { %27 = dma.hbm_to_vmem [thread:$0]  %s792_s1, 4096, %s22_s25, [#allocation3], %s585_s27, %s585_s27, %s586_s28  }
   0xd   :  { %580 = dma.done.wait [#allocation3], 4096  }
   0xe   :  { %581 = vsyncadd [#allocation3], 4294963200  ;;  %v587_v0 = vmov 0.0   ;;  %v76_v1 = vld [vmem:[#allocation2 + $0xf8] sm:$0xff]  ;;  %v75_v3 = vld [vmem:[#allocation2 + $0xf0] sm:$0xff]  ;;  %vm588_vm0 = vmmov 0  }
   0xf   :  { %457 = vmatprep.subr.mxu1 %v587_v0  ;;  %v60_v2 = vld [vmem:[#allocation2 + $0x78] sm:$0xff]  ;;  %388 = vmatprep.subr.mxu0 %v76_v1  ;;  %v59_v4 = vld [vmem:[#allocation2 + $0x70] sm:$0xff]  ;;  %v74_v5 = vld [vmem:[#allocation2 + $0xe8] sm:$0xff]  ;;  %vm366_vm1 = vcmask 80896  }
  0x10   :  { %389 = vmatpush3.msra.mxu0 %v60_v2  ;;  %v58_v6 = vld [vmem:[#allocation2 + $0x68] sm:$0xff]  ;;  %v73_v7 = vld [vmem:[#allocation2 + $0xe0] sm:$0xff]  ;;  %v72_v9 = vld [vmem:[#allocation2 + $0xd8] sm:$0xff]  ;;  %489 = vmatprep.mubr.msk.f32.mxu1 %vm588_vm0, %v587_v0 }
  0x11   :  { %390 = vmatprep.subr.mxu0 %v75_v3  ;;  %v57_v8 = vld [vmem:[#allocation2 + $0x60] sm:$0xff]  ;;  %v56_v10 = vld [vmem:[#allocation2 + $0x58] sm:$0xff]  ;;  %v71_v11 = vld [vmem:[#allocation2 + $0xd0] sm:$0xff] }
  0x12   :  { %391 = vmatpush3.msra.mxu0 %v59_v4  ;;  %v55_v12 = vld [vmem:[#allocation2 + $0x50] sm:$0xff]  ;;  %v70_v13 = vld [vmem:[#allocation2 + $0xc8] sm:$0xff]  ;;  %v69_v15 = vld [vmem:[#allocation2 + $0xc0] sm:$0xff] }
  0x13   :  { %392 = vmatprep.subr.mxu0 %v74_v5  ;;  %v54_v14 = vld [vmem:[#allocation2 + $0x48] sm:$0xff]  ;;  %v639_v16 = vld.sshfl [vmem:[%s791_s0] sm:$0xff pattern:$0x76325410]  ;;  %v194_v18 = vld [vmem:[%s794_s3 + $0x78] sm:$0xff] }
  0x14   :  { %393 = vmatpush3.msra.mxu0 %v58_v6  ;;  %v644_v17 = vld.sshfl [vmem:[%s791_s0 + $0x8] sm:$0xff pattern:$0x76325410]  ;;  %v53_v19 = vld [vmem:[#allocation2 + $0x40] sm:$0xff]  ;;  %458 = vmatpush3.msra.mxu1 %v194_v18  ;;  %v193_v20 = vld [vmem:[%s794_s3 + $0x70] sm:$0xff] }
  0x15   :  { %394 = vmatprep.subr.mxu0 %v73_v7  ;;  %v68_v21 = vld [vmem:[#allocation2 + $0xb8] sm:$0xff]  ;;  %459 = vmatprep.subr.mxu1 %v587_v0  ;;  %v192_v22 = vld [vmem:[%s794_s3 + $0x68] sm:$0xff]  ;;  %v67_v24 = vld [vmem:[#allocation2 + $0xb0] sm:$0xff]  ;;  %v105_v25 = vcombine.high %v639_v16, %v644_v17  ;;  %v104_v45 = vcombine.low %v639_v16, %v644_v17 }
  0x16   :  { %395 = vmatpush3.msra.mxu0 %v57_v8  ;;  %v52_v23 = vld [vmem:[#allocation2 + $0x38] sm:$0xff]  ;;  %460 = vmatpush3.msra.mxu1 %v193_v20  ;;  %v51_v26 = vld [vmem:[#allocation2 + $0x30] sm:$0xff]  ;;  %v191_v27 = vld [vmem:[%s794_s3 + $0x60] sm:$0xff] }
  0x17   :  { %396 = vmatprep.subr.mxu0 %v72_v9  ;;  %461 = vmatprep.subr.mxu1 %v587_v0  ;;  %v66_v28 = vld [vmem:[#allocation2 + $0xa8] sm:$0xff]  ;;  %v190_v30 = vld [vmem:[%s794_s3 + $0x58] sm:$0xff]  ;;  %v65_v31 = vld [vmem:[#allocation2 + $0xa0] sm:$0xff] }
  0x18   :  { %397 = vmatpush3.msra.mxu0 %v56_v10  ;;  %462 = vmatpush3.msra.mxu1 %v192_v22  ;;  %v50_v29 = vld [vmem:[#allocation2 + $0x28] sm:$0xff]  ;;  %v49_v32 = vld [vmem:[#allocation2 + $0x20] sm:$0xff]  ;;  %v189_v33 = vld [vmem:[%s794_s3 + $0x50] sm:$0xff] }
  0x19   :  { %398 = vmatprep.subr.mxu0 %v71_v11  ;;  %172 = vmatprep.mubr.f32.mxu0 %v105_v25  ;;  %v64_v34 = vld [vmem:[#allocation2 + $0x98] sm:$0xff]  ;;  %v188_v36 = vld [vmem:[%s794_s3 + $0x48] sm:$0xff]  ;;  %v63_v37 = vld [vmem:[#allocation2 + $0x90] sm:$0xff] }
  0x1a   :  { %399 = vmatpush3.msra.mxu0 %v55_v12  ;;  %463 = vmatprep.subr.mxu1 %v587_v0  ;;  %v48_v35 = vld [vmem:[#allocation2 + $0x18] sm:$0xff]  ;;  %v47_v38 = vld [vmem:[#allocation2 + $0x10] sm:$0xff]  ;;  %v187_v39 = vld [vmem:[%s794_s3 + $0x40] sm:$0xff] }
  0x1b   :  { %400 = vmatprep.subr.mxu0 %v70_v13  ;;  %464 = vmatpush3.msra.mxu1 %v191_v27  ;;  %v62_v40 = vld [vmem:[#allocation2 + $0x88] sm:$0xff]  ;;  %v186_v42 = vld [vmem:[%s794_s3 + $0x38] sm:$0xff]  ;;  %v61_v43 = vld [vmem:[#allocation2 + $0x80] sm:$0xff] }
  0x1c   :  { %401 = vmatpush3.msra.mxu0 %v54_v14  ;;  %465 = vmatprep.subr.mxu1 %v587_v0  ;;  %v46_v41 = vld [vmem:[#allocation2 + $0x8] sm:$0xff]  ;;  %v45_v44 = vld [vmem:[#allocation2] sm:$0xff]  ;;  %v185_v46 = vld [vmem:[%s794_s3 + $0x30] sm:$0xff] }
  0x1d   :  { %402 = vmatprep.subr.mxu0 %v69_v15  ;;  %466 = vmatpush3.msra.mxu1 %v190_v30  ;;  %v184_v47 = vld [vmem:[%s794_s3 + $0x28] sm:$0xff]  ;;  %v183_v48 = vld [vmem:[%s794_s3 + $0x20] sm:$0xff]  ;;  %v182_v49 = vld [vmem:[%s794_s3 + $0x18] sm:$0xff] }
  0x1e   :  { %403 = vmatpush3.msra.mxu0 %v53_v19  ;;  %467 = vmatprep.subr.mxu1 %v587_v0  ;;  %v181_v50 = vld [vmem:[%s794_s3 + $0x10] sm:$0xff]  ;;  %v180_v51 = vld [vmem:[%s794_s3 + $0x8] sm:$0xff]  ;;  %v179_v52 = vld [vmem:[%s794_s3] sm:$0xff] }
  0x1f   :  { %404 = vmatprep.subr.mxu0 %v68_v21  ;;  %468 = vmatpush3.msra.mxu1 %v189_v33  ;;  %v288_v53 = vld [vmem:[%s796_s5 + $0x78] sm:$0xff]  ;;  %v287_v54 = vld [vmem:[%s796_s5 + $0x70] sm:$0xff]  ;;  %v286_v55 = vld [vmem:[%s796_s5 + $0x68] sm:$0xff] }
  0x20   :  { %405 = vmatpush3.msra.mxu0 %v52_v23  ;;  %469 = vmatprep.subr.mxu1 %v587_v0  ;;  %v285_v56 = vld [vmem:[%s796_s5 + $0x60] sm:$0xff]  ;;  %v284_v57 = vld [vmem:[%s796_s5 + $0x58] sm:$0xff]  ;;  %v283_v58 = vld [vmem:[%s796_s5 + $0x50] sm:$0xff] }
  0x21   :  { %406 = vmatprep.subr.mxu0 %v67_v24  ;;  %470 = vmatpush3.msra.mxu1 %v188_v36  ;;  %v282_v59 = vld [vmem:[%s796_s5 + $0x48] sm:$0xff]  ;;  %v281_v60 = vld [vmem:[%s796_s5 + $0x40] sm:$0xff]  ;;  %v280_v61 = vld [vmem:[%s796_s5 + $0x38] sm:$0xff] }
  0x22   :  { %407 = vmatpush3.msra.mxu0 %v51_v26  ;;  %471 = vmatprep.subr.mxu1 %v587_v0  ;;  %v279_v62 = vld [vmem:[%s796_s5 + $0x30] sm:$0xff]  ;;  %v278_v63 = vld [vmem:[%s796_s5 + $0x28] sm:$0xff]  ;;  %v277_v1 = vld [vmem:[%s796_s5 + $0x20] sm:$0xff] }
  0x23   :  { %408 = vmatprep.subr.mxu0 %v66_v28  ;;  %472 = vmatpush3.msra.mxu1 %v187_v39  ;;  %v276_v2 = vld [vmem:[%s796_s5 + $0x18] sm:$0xff]  ;;  %v385_v4 = vld [vmem:[%s793_s2] ss:$0 sm:$0xff]  ;;  %v275_v9 = vld [vmem:[%s796_s5 + $0x10] sm:$0xff] }
  0x24   :  { %409 = vmatpush3.msra.mxu0 %v50_v29  ;;  %473 = vmatprep.subr.mxu1 %v587_v0  ;;  %v274_v10 = vld [vmem:[%s796_s5 + $0x8] sm:$0xff]  ;;  %v273_v11 = vld [vmem:[%s796_s5] sm:$0xff] }
  0x25   :  { %410 = vmatprep.subr.mxu0 %v65_v31  ;;  %474 = vmatpush3.msra.mxu1 %v186_v42  ;;  %v386_v12 = vld [vmem:[%s795_s4] ss:$0 sm:$0xff] }
  0x26   :  { %411 = vmatpush3.msra.mxu0 %v49_v32  ;;  %475 = vmatprep.subr.mxu1 %v587_v0  ;;  %v387_v17 = vld [vmem:[%s797_s6] ss:$0 sm:$0xff] }
  0x27   :  { %412 = vmatprep.subr.mxu0 %v64_v34  ;;  %476 = vmatpush3.msra.mxu1 %v185_v46 }
  0x28   :  { %413 = vmatpush3.msra.mxu0 %v48_v35  ;;  %477 = vmatprep.subr.mxu1 %v587_v0 }
  0x29   :  { %414 = vmatprep.subr.mxu0 %v63_v37  ;;  %478 = vmatpush3.msra.mxu1 %v184_v47 }
  0x2a   :  { %415 = vmatpush3.msra.mxu0 %v47_v38  ;;  %479 = vmatprep.subr.mxu1 %v587_v0 }
  0x2b   :  { %416 = vmatprep.subr.mxu0 %v62_v40  ;;  %480 = vmatpush3.msra.mxu1 %v183_v48 }
  0x2c   :  { %417 = vmatpush3.msra.mxu0 %v46_v41  ;;  %481 = vmatprep.subr.mxu1 %v587_v0 }
  0x2d   :  { %418 = vmatprep.subr.mxu0 %v61_v43  ;;  %482 = vmatpush3.msra.mxu1 %v182_v49 }
  0x2e   :  { %419 = vmatpush3.msra.mxu0 %v45_v44  ;;  %483 = vmatprep.subr.mxu1 %v587_v0 }
  0x2f   :  { %173 = vmatmul.mubr.f32.vlgmr.msra.gmra.mxu0 %v104_v45  ;;  %492 = vmatprep.subr.mxu0 %v587_v0 }
  0x30   :  { %484 = vmatpush3.msra.mxu1 %v181_v50  ;;  %524 = vmatprep.mubr.msk.f32.mxu0 %vm588_vm0, %v587_v0 }
  0x31   :  { %485 = vmatprep.subr.mxu1 %v587_v0  ;;  %493 = vmatpush3.msra.mxu0 %v288_v53 }
  0x32   :  { %486 = vmatpush3.msra.mxu1 %v180_v51  ;;  %494 = vmatprep.subr.mxu0 %v587_v0 }
  0x33   :  { %487 = vmatprep.subr.mxu1 %v587_v0  ;;  %495 = vmatpush3.msra.mxu0 %v287_v54 }
  0x34   :  { %488 = vmatpush3.msra.mxu1 %v179_v52  ;;  %496 = vmatprep.subr.mxu0 %v587_v0 }
  0x35   :  { %497 = vmatpush3.msra.mxu0 %v286_v55 }
  0x36   :  { %498 = vmatprep.subr.mxu0 %v587_v0 }
  0x37   :  { %499 = vmatpush3.msra.mxu0 %v285_v56 }
  0x38   :  { %500 = vmatprep.subr.mxu0 %v587_v0 }
  0x39   :  { %501 = vmatpush3.msra.mxu0 %v284_v57 }
  0x3a   :  { %502 = vmatprep.subr.mxu0 %v587_v0 }
  0x3b   :  { %503 = vmatpush3.msra.mxu0 %v283_v58 }
  0x3c   :  { %504 = vmatprep.subr.mxu0 %v587_v0 }
  0x3d   :  { %505 = vmatpush3.msra.mxu0 %v282_v59 }
  0x3e   :  { %506 = vmatprep.subr.mxu0 %v587_v0 }
  0x3f   :  { %507 = vmatpush3.msra.mxu0 %v281_v60 }
  0x40   :  { %508 = vmatprep.subr.mxu0 %v587_v0 }
  0x41   :  { %509 = vmatpush3.msra.mxu0 %v280_v61 }
  0x42   :  { %510 = vmatprep.subr.mxu0 %v587_v0 }
  0x43   :  { %511 = vmatpush3.msra.mxu0 %v279_v62 }
  0x44   :  { %512 = vmatprep.subr.mxu0 %v587_v0 }
  0x45   :  { %513 = vmatpush3.msra.mxu0 %v278_v63 }
  0x46   :  { %514 = vmatprep.subr.mxu0 %v587_v0 }
  0x47   :  { %515 = vmatpush3.msra.mxu0 %v277_v1 }
  0x48   :  { %516 = vmatprep.subr.mxu0 %v587_v0 }
  0x49   :  { %517 = vmatpush3.msra.mxu0 %v276_v2 }
  0x4a   :  { %518 = vmatprep.subr.mxu0 %v587_v0 }
  0x4b   :  { %519 = vmatpush3.msra.mxu0 %v275_v9 }
  0x4c   :  { %520 = vmatprep.subr.mxu0 %v587_v0 }
  0x4d   :  { %521 = vmatpush3.msra.mxu0 %v274_v10 }
  0x4e   :  { %522 = vmatprep.subr.mxu0 %v587_v0 }
  0x4f   :  { %523 = vmatpush3.msra.mxu0 %v273_v11 }
  0xef   :  { %v420_v3 = vpop.f32.mrf.mxu0 }
  0xf1   :  { %v421_v5 = vpop.f32.mrf.mxu0 }
  0xf2   :  { %v422_v6 = vadd.f32 %v421_v5, %v420_v3 }
  0xf4   :  { %v175_v7 = vadd.f32 %v422_v6, %v385_v4 }
  0xf6   :  { %v178_v8 = vmax.f32 %v175_v7, 0.0 }
  0xf8   :  { %490 = vmatmul.mubr.f32.vlgmr.msra.gmra.mxu1 %v178_v8 }
 0x1b8   :  { %v268_v13 = vpop.f32.mrf.mxu1 }
 0x1b9   :  { %v269_v14 = vadd.f32 %v386_v12, %v268_v13 }
 0x1ba   :  { %v491_v15 = vpop.f32.mrf.mxu1 }
 0x1bb   :  { %v272_v16 = vmax.f32 %v269_v14, 0.0 }
 0x1bd   :  { %525 = vmatmul.mubr.f32.vlgmr.msra.gmra.mxu0 %v272_v16 }
 0x27d   :  { %v362_v18 = vpop.f32.mrf.mxu0 }
 0x27e   :  { %v363_v0 = vadd.f32 %v387_v17, %v362_v18 }
 0x27f   :  { %v526_v19 = vpop.f32.mrf.mxu0 }
 0x280   :  { %367 = vst.msk [vmem:[#allocation5] sm:$0xff] %vm366_vm1, %v363_v0 }
 0x281   :  { %372 = vsyncadd [#allocation4], 96  ;;  %s589_s5 = smov [#allocation5]  }
 0x282   :  { %s373_s27 = sshll.u32 %s589_s5, 4  ;;  %s374_s27 = int_to_ptr.vmem [resolvable:$true] %s373_s27 }
 0x283   :  { %s560_s28 = scalar_lea.vmem %s374_s27, 32  ;;  %s564_s4 = scalar_lea.vmem %s374_s27, 128 }
 0x284   :  { %p561_p5 = scmp.ne.s32.totalorder %s374_s27, %s560_s28  ;;  %p565_p6 = scmp.lt.s32.totalorder %s374_s27, %s374_s27 }
 0x285   :  { %p566_p7 = scmp.lt.s32.totalorder %s564_s4, %s560_s28 }
 0x287   :  { %p567_p8 = por %p566_p7, %p565_p6 }
 0x289   :  { %p568_p9 = pnand %p567_p8, %p561_p5 }
 0x28b   :  { %571 = shalt.err (!%p568_p9)
}
 0x28c   :  { %s590_s29 = smov 32   ;;  %s591_s30 = smov 2  }
 0x28d   :  { %379 = dma.vmem_to_hbm [thread:$0]  %s374_s27, 32, %s798_s7, [#allocation4], %s590_s29, %s590_s29, %s591_s30  }
 0x28e   :  { %582 = dma.done.wait [#allocation4], 128  }
 0x28f   :  { %583 = vsyncadd [#allocation4], 4294967168 }
 0x290   :  { %383 = vsyncpa [#allocation3], 1 }
 0x291   :  { %384 = vsyncpa [#allocation4], 1 }

</bundles_post_ra>
